<compile_context>
chip_gen: v6e
topology: v6e:2x2x1
jax: 0.10.0
libtpu: 0.0.40
codegen_flags: <defaults>
</compile_context>

<pallas_src>
import functools

import jax
import jax.numpy as jnp
from jax.experimental import pallas as pl
from jax.experimental.pallas import tpu as pltpu


def _clamp_kernel(x_ref, o_ref, *, lo, hi):
    """Elementwise clamp on one (tile_rows, cols) lane-dense block."""
    v = x_ref[...]
    if lo is not None:                       # static (module construction time)
        v = jnp.maximum(v, jnp.asarray(lo, v.dtype))
    if hi is not None:
        v = jnp.minimum(v, jnp.asarray(hi, v.dtype))
    o_ref[...] = v


def _pick_cols(total: int, max_cols: int = 1024) -> int:
    """Largest multiple of 128 (<= max_cols) dividing `total` (total % 128 == 0)."""
    for c in range(max_cols, 0, -128):
        if total % c == 0:
            return c
    return 128


def clamper(x: jax.Array, min_val=None, max_val=None, donate_input: bool = False) -> jax.Array:
    """Forward pass of Clamper: torch.clamp(x, min_val, max_val)."""
    if min_val is None and max_val is None:
        return x                              # torch.clamp with both None is identity
    if x.size == 0:
        return x

    orig_shape = x.shape
    total = int(x.size)
    itemsize = jnp.dtype(x.dtype).itemsize
    LANE = 128
    SUB = max(8, 32 // itemsize)              # native sublane tile: 8 f32 / 16 bf16 / 32 i8
    TARGET_BLOCK_BYTES = 4 << 20              # ~4 MiB blocks; x4 (in+out, double buffered)

    flat = x.reshape(-1)                      # metadata-only for contiguous arrays
    pad = (-total) % LANE
    if pad:
        # Rare fallback (total not a multiple of 128): costs one extra pad pass
        # and one slice pass.  The common NN-tensor path never takes it.
        flat = jnp.pad(flat, (0, pad))
    padded_total = total + pad

    cols = _pick_cols(padded_total)           # divides padded_total -> no row padding
    rows = padded_total // cols
    x2d = flat.reshape(rows, cols)

    if rows <= SUB:
        tile_rows = rows                      # tiny input: single full-dim block
    else:
        cap = max(SUB, (TARGET_BLOCK_BYTES // (cols * itemsize)) // SUB * SUB)
        tile_rows = max(SUB, min(cap, (rows // SUB) * SUB))
        # Guarantee >=2 grid steps so "parallel" can shard across both v7x TCs.
        while tile_rows > SUB and -(-rows // tile_rows) < 2:
            tile_rows = max(SUB, (tile_rows // 2 // SUB) * SUB)

    grid = pl.cdiv(rows, tile_rows)           # ragged last block clipped by Pallas

    kernel = functools.partial(_clamp_kernel, lo=min_val, hi=max_val)
    n_bounds = int(min_val is not None) + int(max_val is not None)

    out2d = pl.pallas_call(
        kernel,
        out_shape=jax.ShapeDtypeStruct((rows, cols), x.dtype),
        grid_spec=pltpu.PrefetchScalarGridSpec(
            num_scalar_prefetch=0,
            grid=(grid,),
            in_specs=[pl.BlockSpec((tile_rows, cols), lambda i: (i, 0))],
            out_specs=pl.BlockSpec((tile_rows, cols), lambda i: (i, 0)),
        ),
        compiler_params=pltpu.CompilerParams(
            dimension_semantics=("parallel",),
            vmem_limit_bytes=32 << 20,
        ),
        cost_estimate=pl.CostEstimate(
            flops=n_bounds * total,
            transcendentals=0,
            bytes_accessed=2 * padded_total * itemsize),
        input_output_aliases=({0: 0} if donate_input else {}),
    )(x2d)

    if pad:
        return out2d.reshape(-1)[:total].reshape(orig_shape)
    return out2d.reshape(orig_shape)


if __name__ == "__main__":
    key = jax.random.PRNGKey(0)

    def ref_clamp(a, lo, hi):
        if lo is not None:
            a = jnp.maximum(a, jnp.asarray(lo, a.dtype))
        if hi is not None:
            a = jnp.minimum(a, jnp.asarray(hi, a.dtype))
        return a

    # 1) Two-sided clamp, Clamper(min=-0.5, max=0.5), B,C,H,W = 2,4,16,16.
    x = jax.random.normal(key, (2, 4, 16, 16), dtype=jnp.float32)
    out = jax.block_until_ready(clamper(x, -0.5, 0.5))
    assert out.shape == x.shape
    assert jnp.array_equal(out, ref_clamp(x, -0.5, 0.5)), "mismatch (two-sided)"

    # 2) Larger slab exercising a multi-step grid (rows > sublane tile).
    k2 = jax.random.PRNGKey(1)
    x2 = jax.random.normal(k2, (4, 8, 16, 32), dtype=jnp.float32)
    out2 = jax.block_until_ready(clamper(x2, -1.0, 1.0))
    assert jnp.array_equal(out2, ref_clamp(x2, -1.0, 1.0)), "mismatch (multi-block)"

    # 3) Ragged total (not a multiple of 128) -> pad/slice fallback + ragged grid.
    k3 = jax.random.PRNGKey(2)
    x3 = jax.random.normal(k3, (5, 3, 8, 13), dtype=jnp.float32)
    out3 = jax.block_until_ready(clamper(x3, None, 0.25))   # max-only clamp
    assert jnp.array_equal(out3, ref_clamp(x3, None, 0.25)), "mismatch (ragged/max-only)"

    # 4) bf16 dtype (sublane tile = 16), min-only clamp.
    x4 = x.astype(jnp.bfloat16)
    out4 = jax.block_until_ready(clamper(x4, 0.0, None))
    assert jnp.array_equal(out4, ref_clamp(x4, 0.0, None)), "mismatch (bf16/min-only)"

    # 5) Donated input (input_output_aliases={0: 0}) under jit with donation.
    clamp_donated = jax.jit(
        functools.partial(clamper, min_val=0.0, max_val=None, donate_input=True),
        donate_argnums=0)
    x_don = x + 0.0                                          # fresh buffer to donate
    out5 = jax.block_until_ready(clamp_donated(x_don))
    assert jnp.array_equal(out5, ref_clamp(x, 0.0, None)), "mismatch (donated)"

    print("KERNEL_OK")
</pallas_src>

<mosaic_0001>
module attributes {stable_mosaic.version = 11 : i64} {
  func.func @_clamp_kernel(%arg0: i32, %arg1: memref<2x1024xf32, #tpu.memory_space<vmem>>, %arg2: memref<2x1024xf32, #tpu.memory_space<vmem>>) attributes {dimension_semantics = [#tpu.dimension_semantics<parallel>], iteration_bounds = array<i64: 1>, scalar_prefetch = 0 : i64, scratch_operands = 0 : i64, tpu.core_type = #tpu.core_type<tc>, window_params = [{transform_indices = @transform_0, window_bounds = array<i64: 2, 1024>}, {transform_indices = @transform_1, window_bounds = array<i64: 2, 1024>}]} {
    %c0 = arith.constant 0 : index
    %c0_0 = arith.constant 0 : index
    %0 = vector.load %arg1[%c0, %c0_0] : memref<2x1024xf32, #tpu.memory_space<vmem>>, vector<2x1024xf32>
    %cst = arith.constant -5.000000e-01 : f32
    %1 = vector.broadcast %cst : f32 to vector<2x1024xf32>
    %2 = arith.maximumf %0, %1 : vector<2x1024xf32>
    %cst_1 = arith.constant 5.000000e-01 : f32
    %3 = vector.broadcast %cst_1 : f32 to vector<2x1024xf32>
    %4 = arith.minimumf %2, %3 : vector<2x1024xf32>
    %c0_2 = arith.constant 0 : index
    %c0_3 = arith.constant 0 : index
    %5 = vector.load %arg2[%c0_2, %c0_3] : memref<2x1024xf32, #tpu.memory_space<vmem>>, vector<2x1024xf32>
    tpu.vector_store %arg2[%c0_2, %c0_3], %4 {strides = array<i32>} : memref<2x1024xf32, #tpu.memory_space<vmem>>, vector<2x1024xf32>,
    return
  }
  func.func @transform_0(%arg0: i32) -> (i32, i32) {
    %c0_i32 = arith.constant 0 : i32
    %c0_i32_0 = arith.constant 0 : i32
    return %arg0, %c0_i32 : i32, i32
  }
  func.func @transform_1(%arg0: i32) -> (i32, i32) {
    %c0_i32 = arith.constant 0 : i32
    %c0_i32_0 = arith.constant 0 : i32
    return %arg0, %c0_i32 : i32, i32
  }
}

</mosaic_0001>

<bundles_post_ra>
// kernel: tpu_custom_call.1
= control target key start
LH: loop header
LB: loop body
LE: loop exit
PB: predicated region body
PF: predicated region fallthrough
CT: control target
= control target key end

     0   :  { %6 = vsyncpa [#allocation3], 0  ;;  %s110_s0 = inlined_call_operand.hbm [shape: f32[2,1024], index: 0, kind: input, shape index: {}]   ;;  %s111_s1 = inlined_call_operand.hbm [shape: f32[2,1024], index: 1, kind: output, shape index: {}]  }
   0x1   :  { %7 = vsyncpa [#allocation4], 0  ;;  %s92_s6 = smov [#allocation2]  }
   0x2   :  { %s14_s7 = sshll.u32 %s92_s6, 4  ;;  %s15_s7 = int_to_ptr.vmem [resolvable:$true] %s14_s7 }
   0x3   :  { %s56_s8 = scalar_lea.vmem %s15_s7, 256  ;;  %p61_p1 = scmp.lt.s32.totalorder %s15_s7, %s15_s7 }
   0x4   :  { %p57_p0 = scmp.ne.s32.totalorder %s15_s7, %s56_s8  ;;  %p62_p2 = scmp.lt.s32.totalorder %s56_s8, %s56_s8 }
   0x6   :  { %p63_p3 = por %p62_p2, %p61_p1 }
   0x8   :  { %p64_p4 = pnand %p63_p3, %p57_p0 }
   0xa   :  { %67 = shalt.err (!%p64_p4)
}
   0xb   :  { %17 = dma.hbm_to_vmem [thread:$0]  %s110_s0, 256, %s15_s7, [#allocation3]  }
   0xc   :  { %88 = dma.done.wait [#allocation3], 256  }
   0xd   :  { %89 = vsyncadd [#allocation3], 4294967040  ;;  %s93_s11 = smov [#allocation5]   ;;  %v21_v0 = vld [vmem:[#allocation2] sm:$0xff]  ;;  %v22_v1 = vld [vmem:[#allocation2 + $0x8] sm:$0xff] }
   0xe   :  { %s35_s12 = sshll.u32 %s93_s11, 4  ;;  %v44_v2 = vclamps-f32 %v21_v0, 0.5  ;;  %v45_v3 = vclamps-f32 %v22_v1, 0.5  ;;  %s36_s12 = int_to_ptr.vmem [resolvable:$true] %s35_s12 }
   0xf   :  { %s68_s13 = scalar_lea.vmem %s36_s12, 256  ;;  %p73_p6 = scmp.lt.s32.totalorder %s36_s12, %s36_s12 }
  0x10   :  { %27 = vst [vmem:[#allocation5] sm:$0xff] %v44_v2  ;;  %28 = vst [vmem:[#allocation5 + $0x8] sm:$0xff] %v45_v3  ;;  %p69_p5 = scmp.ne.s32.totalorder %s36_s12, %s68_s13  ;;  %p74_p7 = scmp.lt.s32.totalorder %s68_s13, %s68_s13 }
  0x12   :  { %p75_p8 = por %p74_p7, %p73_p6 }
  0x14   :  { %p76_p9 = pnand %p75_p8, %p69_p5 }
  0x16   :  { %79 = shalt.err (!%p76_p9)
}
  0x17   :  { %38 = dma.vmem_to_hbm [thread:$0]  %s36_s12, 256, %s111_s1, [#allocation4]  }
  0x18   :  { %90 = dma.done.wait [#allocation4], 256  }
  0x19   :  { %91 = vsyncadd [#allocation4], 4294967040 }
  0x1a   :  { %42 = vsyncpa [#allocation3], 1 }
  0x1b   :  { %43 = vsyncpa [#allocation4], 1 }

</bundles_post_ra>
